<compile_context>
chip_gen: v7x
topology: tpu7x:2x2x1
jax: 0.10.0
libtpu: 0.0.40
codegen_flags: <defaults>
</compile_context>

<pallas_src>
import jax
import jax.numpy as jnp
from jax.experimental import pallas as pl
from jax.experimental.pallas import tpu as pltpu


def _agg_reg_kernel(mid_ref, hig_ref, wq_ref, bq_ref, wk_ref, bk_ref,
                    wv_ref, bv_ref, out_ref):
    # mid_ref : (TB, N, D)    hig_ref : (TB, D)
    # wq/wk   : (D, D) (in, out)   bq/bk/wv : (1, D)
    # bv_ref  : (1,) scalar in SMEM
    # out_ref : (TB, D)
    TB, N, D = mid_ref.shape

    mid = mid_ref[...]                                          # (TB, N, D)
    hig = hig_ref[...]                                          # (TB, D)

    # rar_k_w(mid): Linear + Tanh, one stacked MXU matmul for the whole tile.
    # (TB, N, D) -> (TB*N, D) is layout-preserving here (N sublane-aligned).
    mid_rows = mid.reshape(TB * N, D)
    mid_k = jnp.tanh(
        jnp.dot(mid_rows, wk_ref[...], preferred_element_type=jnp.float32)
        + bk_ref[...]).reshape(TB, N, D)                        # (TB, N, D)

    # rar_q_w(hig): Linear + Tanh, with the Linear(D->1) weight folded in.
    hig_q = jnp.tanh(
        jnp.dot(hig, wq_ref[...], preferred_element_type=jnp.float32)
        + bq_ref[...])                                          # (TB, D)
    hqv = hig_q * wv_ref[...]                                   # (TB, D)

    # rar_v_w(mid_k * hig_q): lane reduction over D, + scalar bias.
    # Keep the score in (TB, N, 1) (N on sublanes) so attention broadcasts
    # over D lanes without relayout.
    scores = (jnp.sum(mid_k * hqv[:, None, :], axis=-1, keepdims=True)
              + bv_ref[0])                                      # (TB, N, 1)

    # softmax over the N regions (dim=1)
    scores = scores - jnp.max(scores, axis=1, keepdims=True)
    e = jnp.exp(scores)
    attn = e * pl.reciprocal(jnp.sum(e, axis=1, keepdims=True),
                             approx=True)                       # (TB, N, 1)

    # weighted aggregation of raw `mid`: VPU multiply + sublane reduce.
    new_hig = jnp.sum(attn * mid, axis=1)                       # (TB, D)

    # l2norm(new_hig, dim=-1): x / (sqrt(sum(x^2)) + eps)
    norm = jnp.sqrt(jnp.sum(new_hig * new_hig, axis=-1, keepdims=True)) + 1e-8
    out_ref[...] = new_hig * pl.reciprocal(norm, approx=True)


def aggregation_regulator(mid, hig, params):
    """mid: (B, N, D) f32, hig: (B, D) f32  ->  (B, D) f32."""
    B, N, D = mid.shape
    wq, bq, wk, bk, wv, bv = params

    # --- pick a batch tile -------------------------------------------------
    # Stack samples so each grid step issues one big (TB*N, D) @ (D, D)
    # matmul. Budget the f32 `mid` block so double-buffered inputs plus the
    # ~3-4x of in-kernel (TB, N, D) temporaries stay well inside v7x's
    # smaller scoped VMEM; amortize the ~0.35 us per-step pipeline overhead
    # by targeting thousands of stacked rows per step.
    rows_per_sample = max(1, N)
    rows_target = 8192                                   # stacked MXU rows/step
    mid_block_budget = 4 << 20                           # f32 bytes of mid/step
    cap_rows = max(1, mid_block_budget // (rows_per_sample * D * 4))
    TB = max(1, min(B, rows_target // rows_per_sample, cap_rows))
    if TB < B:
        # (TB, D) hig/out blocks put TB on the sublane axis -> multiple of 8
        # unless the tile spans the whole batch; re-clamp after rounding so
        # the just-computed VMEM cap is still honored where possible.
        TB = max(8, (TB // 8) * 8)
        TB = min(TB, max(8, (min(cap_rows, rows_target // rows_per_sample) // 8) * 8))
    # Give both v7x TensorCores work on large batches (no-op for 1-TC chips).
    if B * rows_per_sample >= 1024 and -(-B // TB) < 2:
        half = max(8, ((TB // 2) // 8) * 8)
        if half < B:
            TB = half

    num_steps = -(-B // TB)
    grid = (num_steps,)

    # Explicit VMEM budget (sized for v7x's 64 MiB physical / 32 MiB scoped).
    mid_block_bytes = TB * N * D * 4
    vmem_need = (8 * mid_block_bytes              # in dbl-buf + temporaries
                 + 4 * TB * D * 4                 # hig/out double buffers
                 + (2 * D * D + 4 * D) * 4        # weights/biases
                 + (1 << 20))                     # headroom
    vmem_limit = int(min(48 << 20, max(16 << 20, vmem_need)))

    bq2 = bq.reshape(1, D)
    bk2 = bk.reshape(1, D)
    wv2 = wv.reshape(1, D)        # Linear(D, 1) weight, used as reduction vector
    bv1 = bv.reshape(1)           # true scalar -> SMEM

    out = pl.pallas_call(
        _agg_reg_kernel,
        out_shape=jax.ShapeDtypeStruct((B, D), jnp.float32),
        grid=grid,
        in_specs=[
            pl.BlockSpec((TB, N, D), lambda b: (b, 0, 0)),   # mid
            pl.BlockSpec((TB, D), lambda b: (b, 0)),         # hig
            pl.BlockSpec((D, D), lambda b: (0, 0)),          # Wq (in, out)
            pl.BlockSpec((1, D), lambda b: (0, 0)),          # bq
            pl.BlockSpec((D, D), lambda b: (0, 0)),          # Wk (in, out)
            pl.BlockSpec((1, D), lambda b: (0, 0)),          # bk
            pl.BlockSpec((1, D), lambda b: (0, 0)),          # wv
            pl.BlockSpec(memory_space=pltpu.MemorySpace.SMEM),  # bv (scalar)
        ],
        out_specs=pl.BlockSpec((TB, D), lambda b: (b, 0)),   # dense (TB, D) slab
        compiler_params=pltpu.CompilerParams(
            dimension_semantics=("parallel",),
            vmem_limit_bytes=vmem_limit),
    )(mid, hig, wq, bq2, wk, bk2, wv2, bv1)
    return out


def _reference(mid, hig, params):
    """Pure-JAX reference of the PyTorch forward (eval mode)."""
    wq, bq, wk, bk, wv, bv = params
    mid_k = jnp.tanh(mid @ wk + bk)                       # (B, N, D)
    hig_q = jnp.tanh(hig @ wq + bq)                       # (B, D)
    w = mid_k * hig_q[:, None, :]                         # (B, N, D)
    s = jnp.einsum('bnd,d->bn', w, wv) + bv[0]            # (B, N)
    attn = jax.nn.softmax(s, axis=1)                      # (B, N)
    new_hig = jnp.sum(attn[:, :, None] * mid, axis=1)     # (B, D)
    norm = jnp.sqrt(jnp.sum(new_hig ** 2, axis=-1, keepdims=True)) + 1e-8
    return new_hig / norm


def init_params(key, sim_dim):
    """Deterministic synthetic parameters (shapes from nn.Linear in __init__)."""
    ks = jax.random.split(key, 6)
    scale = 1.0 / jnp.sqrt(jnp.float32(sim_dim))
    wq = jax.random.uniform(ks[0], (sim_dim, sim_dim), jnp.float32, -scale, scale)
    bq = jax.random.uniform(ks[1], (sim_dim,), jnp.float32, -scale, scale)
    wk = jax.random.uniform(ks[2], (sim_dim, sim_dim), jnp.float32, -scale, scale)
    bk = jax.random.uniform(ks[3], (sim_dim,), jnp.float32, -scale, scale)
    wv = jax.random.uniform(ks[4], (sim_dim,), jnp.float32, -scale, scale)
    bv = jax.random.uniform(ks[5], (1,), jnp.float32, -scale, scale)
    return wq, bq, wk, bk, wv, bv


if __name__ == "__main__":
    B, N, SIM_DIM = 2, 8, 32   # embed_dim is unused in forward()

    key = jax.random.PRNGKey(0)
    k_mid, k_hig, k_par = jax.random.split(key, 3)
    mid = jax.random.normal(k_mid, (B, N, SIM_DIM), jnp.float32)
    hig = jax.random.normal(k_hig, (B, SIM_DIM), jnp.float32)
    params = init_params(k_par, SIM_DIM)

    out = aggregation_regulator(mid, hig, params)
    out = jax.block_until_ready(out)

    ref = _reference(mid, hig, params)
    assert out.shape == (B, SIM_DIM)
    # EUP approx reciprocal has ~2^-12 relative error (the softmax rcp error
    # largely cancels through the final l2norm), so verify at 1e-3.
    assert jnp.allclose(out, ref, atol=1e-3, rtol=1e-3)

    print("KERNEL_OK")
</pallas_src>

<mosaic_0001>
module attributes {stable_mosaic.version = 11 : i64} {
  func.func @_agg_reg_kernel(%arg0: i32, %arg1: memref<2x8x32xf32, #tpu.memory_space<vmem>>, %arg2: memref<2x32xf32, #tpu.memory_space<vmem>>, %arg3: memref<32x32xf32, #tpu.memory_space<vmem>>, %arg4: memref<1x32xf32, #tpu.memory_space<vmem>>, %arg5: memref<32x32xf32, #tpu.memory_space<vmem>>, %arg6: memref<1x32xf32, #tpu.memory_space<vmem>>, %arg7: memref<1x32xf32, #tpu.memory_space<vmem>>, %arg8: memref<1xf32, #tpu.memory_space<smem>>, %arg9: memref<2x32xf32, #tpu.memory_space<vmem>>) attributes {dimension_semantics = [#tpu.dimension_semantics<parallel>], iteration_bounds = array<i64: 1>, scalar_prefetch = 0 : i64, scratch_operands = 0 : i64, tpu.core_type = #tpu.core_type<tc>, window_params = [{transform_indices = @transform_0, window_bounds = array<i64: 2, 8, 32>}, {transform_indices = @transform_1, window_bounds = array<i64: 2, 32>}, {pipeline_mode = #tpu.pipeline_mode<synchronous>, transform_indices = @transform_2, window_bounds = array<i64: 32, 32>}, {pipeline_mode = #tpu.pipeline_mode<synchronous>, transform_indices = @transform_3, window_bounds = array<i64: 1, 32>}, {pipeline_mode = #tpu.pipeline_mode<synchronous>, transform_indices = @transform_4, window_bounds = array<i64: 32, 32>}, {pipeline_mode = #tpu.pipeline_mode<synchronous>, transform_indices = @transform_5, window_bounds = array<i64: 1, 32>}, {pipeline_mode = #tpu.pipeline_mode<synchronous>, transform_indices = @transform_6, window_bounds = array<i64: 1, 32>}, {transform_indices = @transform_7, window_bounds = array<i64: 1>}, {transform_indices = @transform_8, window_bounds = array<i64: 2, 32>}]} {
    %c0 = arith.constant 0 : index
    %c0_0 = arith.constant 0 : index
    %c0_1 = arith.constant 0 : index
    %0 = vector.load %arg1[%c0, %c0_0, %c0_1] : memref<2x8x32xf32, #tpu.memory_space<vmem>>, vector<2x8x32xf32>
    %c0_2 = arith.constant 0 : index
    %c0_3 = arith.constant 0 : index
    %1 = vector.load %arg2[%c0_2, %c0_3] : memref<2x32xf32, #tpu.memory_space<vmem>>, vector<2x32xf32>
    %2 = vector.shape_cast %0 : vector<2x8x32xf32> to vector<16x32xf32>
    %c0_4 = arith.constant 0 : index
    %c0_5 = arith.constant 0 : index
    %3 = vector.load %arg5[%c0_4, %c0_5] : memref<32x32xf32, #tpu.memory_space<vmem>>, vector<32x32xf32>
    %cst = arith.constant dense<0.000000e+00> : vector<16x32xf32>
    %4 = tpu.matmul %2, %3, %cst {dimension_numbers = #tpu.dot_dimension_numbers<[1], [0], [0], [1], [0, 0, 1, 1], [], []>} : vector<16x32xf32>, vector<32x32xf32>, vector<16x32xf32> -> vector<16x32xf32>
    %c0_6 = arith.constant 0 : index
    %c0_7 = arith.constant 0 : index
    %5 = vector.load %arg6[%c0_6, %c0_7] : memref<1x32xf32, #tpu.memory_space<vmem>>, vector<1x32xf32>
    %6 = vector.broadcast %5 : vector<1x32xf32> to vector<16x32xf32>
    %7 = arith.addf %4, %6 : vector<16x32xf32>
    %8 = math.tanh %7 : vector<16x32xf32>
    %9 = vector.shape_cast %8 : vector<16x32xf32> to vector<2x8x32xf32>
    %c0_8 = arith.constant 0 : index
    %c0_9 = arith.constant 0 : index
    %10 = vector.load %arg3[%c0_8, %c0_9] : memref<32x32xf32, #tpu.memory_space<vmem>>, vector<32x32xf32>
    %cst_10 = arith.constant dense<0.000000e+00> : vector<2x32xf32>
    %11 = tpu.matmul %1, %10, %cst_10 {dimension_numbers = #tpu.dot_dimension_numbers<[1], [0], [0], [1], [0, 0, 1, 1], [], []>} : vector<2x32xf32>, vector<32x32xf32>, vector<2x32xf32> -> vector<2x32xf32>
    %c0_11 = arith.constant 0 : index
    %c0_12 = arith.constant 0 : index
    %12 = vector.load %arg4[%c0_11, %c0_12] : memref<1x32xf32, #tpu.memory_space<vmem>>, vector<1x32xf32>
    %13 = vector.broadcast %12 : vector<1x32xf32> to vector<2x32xf32>
    %14 = arith.addf %11, %13 : vector<2x32xf32>
    %15 = math.tanh %14 : vector<2x32xf32>
    %c0_13 = arith.constant 0 : index
    %c0_14 = arith.constant 0 : index
    %16 = vector.load %arg7[%c0_13, %c0_14] : memref<1x32xf32, #tpu.memory_space<vmem>>, vector<1x32xf32>
    %17 = vector.broadcast %16 : vector<1x32xf32> to vector<2x32xf32>
    %18 = arith.mulf %15, %17 : vector<2x32xf32>
    %19 = vector.shape_cast %18 : vector<2x32xf32> to vector<2x1x32xf32>
    %20 = vector.broadcast %19 : vector<2x1x32xf32> to vector<2x8x32xf32>
    %21 = arith.mulf %9, %20 : vector<2x8x32xf32>
    %cst_15 = arith.constant dense<0.000000e+00> : vector<2x8xf32>
    %22 = vector.multi_reduction <add>, %21, %cst_15 [2] : vector<2x8x32xf32> to vector<2x8xf32>
    %23 = vector.shape_cast %22 : vector<2x8xf32> to vector<2x8x1xf32>
    %c0_16 = arith.constant 0 : index
    %24 = memref.load %arg8[%c0_16] : memref<1xf32, #tpu.memory_space<smem>>
    %25 = vector.broadcast %24 : f32 to vector<2x8x1xf32>
    %26 = arith.addf %23, %25 : vector<2x8x1xf32>
    %cst_17 = arith.constant dense<0xFF800000> : vector<2x1xf32>
    %27 = vector.multi_reduction <maximumf>, %26, %cst_17 [1] : vector<2x8x1xf32> to vector<2x1xf32>
    %28 = vector.shape_cast %27 : vector<2x1xf32> to vector<2x1x1xf32>
    %29 = vector.broadcast %28 : vector<2x1x1xf32> to vector<2x8x1xf32>
    %30 = arith.subf %26, %29 : vector<2x8x1xf32>
    %31 = math.exp %30 : vector<2x8x1xf32>
    %cst_18 = arith.constant dense<0.000000e+00> : vector<2x1xf32>
    %32 = vector.multi_reduction <add>, %31, %cst_18 [1] : vector<2x8x1xf32> to vector<2x1xf32>
    %33 = vector.shape_cast %32 : vector<2x1xf32> to vector<2x1x1xf32>
    %34 = tpu.reciprocal %33 {approx = true} : vector<2x1x1xf32> -> vector<2x1x1xf32>
    %35 = vector.broadcast %34 : vector<2x1x1xf32> to vector<2x8x1xf32>
    %36 = arith.mulf %31, %35 : vector<2x8x1xf32>
    %37 = vector.broadcast %36 : vector<2x8x1xf32> to vector<2x8x32xf32>
    %38 = arith.mulf %37, %0 : vector<2x8x32xf32>
    %cst_19 = arith.constant dense<0.000000e+00> : vector<2x32xf32>
    %39 = vector.multi_reduction <add>, %38, %cst_19 [1] : vector<2x8x32xf32> to vector<2x32xf32>
    %40 = arith.mulf %39, %39 : vector<2x32xf32>
    %cst_20 = arith.constant dense<0.000000e+00> : vector<2xf32>
    %41 = vector.multi_reduction <add>, %40, %cst_20 [1] : vector<2x32xf32> to vector<2xf32>
    %42 = vector.shape_cast %41 : vector<2xf32> to vector<2x1xf32>
    %43 = math.sqrt %42 : vector<2x1xf32>
    %cst_21 = arith.constant 9.99999993E-9 : f32
    %44 = vector.broadcast %cst_21 : f32 to vector<2x1xf32>
    %45 = arith.addf %43, %44 : vector<2x1xf32>
    %46 = tpu.reciprocal %45 {approx = true} : vector<2x1xf32> -> vector<2x1xf32>
    %47 = vector.broadcast %46 : vector<2x1xf32> to vector<2x32xf32>
    %48 = arith.mulf %39, %47 : vector<2x32xf32>
    %c0_22 = arith.constant 0 : index
    %c0_23 = arith.constant 0 : index
    %49 = vector.load %arg9[%c0_22, %c0_23] : memref<2x32xf32, #tpu.memory_space<vmem>>, vector<2x32xf32>
    tpu.vector_store %arg9[%c0_22, %c0_23], %48 {strides = array<i32>} : memref<2x32xf32, #tpu.memory_space<vmem>>, vector<2x32xf32>,
    return
  }
  func.func @transform_0(%arg0: i32) -> (i32, i32, i32) {
    %c0_i32 = arith.constant 0 : i32
    %c0_i32_0 = arith.constant 0 : i32
    %c0_i32_1 = arith.constant 0 : i32
    return %arg0, %c0_i32, %c0_i32_0 : i32, i32, i32
  }
  func.func @transform_1(%arg0: i32) -> (i32, i32) {
    %c0_i32 = arith.constant 0 : i32
    %c0_i32_0 = arith.constant 0 : i32
    return %arg0, %c0_i32 : i32, i32
  }
  func.func @transform_2(%arg0: i32) -> (i32, i32) {
    %c0_i32 = arith.constant 0 : i32
    %c0_i32_0 = arith.constant 0 : i32
    %c0_i32_1 = arith.constant 0 : i32
    return %c0_i32, %c0_i32_0 : i32, i32
  }
  func.func @transform_3(%arg0: i32) -> (i32, i32) {
    %c0_i32 = arith.constant 0 : i32
    %c0_i32_0 = arith.constant 0 : i32
    %c0_i32_1 = arith.constant 0 : i32
    return %c0_i32, %c0_i32_0 : i32, i32
  }
  func.func @transform_4(%arg0: i32) -> (i32, i32) {
    %c0_i32 = arith.constant 0 : i32
    %c0_i32_0 = arith.constant 0 : i32
    %c0_i32_1 = arith.constant 0 : i32
    return %c0_i32, %c0_i32_0 : i32, i32
  }
  func.func @transform_5(%arg0: i32) -> (i32, i32) {
    %c0_i32 = arith.constant 0 : i32
    %c0_i32_0 = arith.constant 0 : i32
    %c0_i32_1 = arith.constant 0 : i32
    return %c0_i32, %c0_i32_0 : i32, i32
  }
  func.func @transform_6(%arg0: i32) -> (i32, i32) {
    %c0_i32 = arith.constant 0 : i32
    %c0_i32_0 = arith.constant 0 : i32
    %c0_i32_1 = arith.constant 0 : i32
    return %c0_i32, %c0_i32_0 : i32, i32
  }
  func.func @transform_7(%arg0: i32) -> i32 {
    %c0_i32 = arith.constant 0 : i32
    %c0_i32_0 = arith.constant 0 : i32
    return %c0_i32 : i32
  }
  func.func @transform_8(%arg0: i32) -> (i32, i32) {
    %c0_i32 = arith.constant 0 : i32
    %c0_i32_0 = arith.constant 0 : i32
    return %arg0, %c0_i32 : i32, i32
  }
}

</mosaic_0001>

<bundles_post_ra>
// kernel: tpu_custom_call.1
= control target key start
LH: loop header
LB: loop body
LE: loop exit
PB: predicated region body
PF: predicated region fallthrough
CT: control target
= control target key end

     0   :  { %14 = vsyncpa [#allocation4], 0  ;;  %s734_s0 = inlined_call_operand.hbm [shape: f32[2,8,32], index: 0, kind: input, shape index: {}]   ;;  %s735_s1 = inlined_call_operand.vmem [shape: f32[2,32], index: 1, kind: input, shape index: {}]   ;;  %s736_s2 = inlined_call_operand.hbm [shape: f32[32,32], index: 2, kind: input, shape index: {}]   ;;  %s737_s3 = inlined_call_operand.vmem [shape: f32[1,32], index: 3, kind: input, shape index: {}]   ;;  %s738_s4 = inlined_call_operand.hbm [shape: f32[32,32], index: 4, kind: input, shape index: {}]   ;;  %s739_s5 = inlined_call_operand.vmem [shape: f32[1,32], index: 5, kind: input, shape index: {}]   ;;  %s740_s6 = inlined_call_operand.vmem [shape: f32[1,32], index: 6, kind: input, shape index: {}]   ;;  %s741_s7 = inlined_call_operand.<no memory space> [shape: f32[1], index: 7, kind: input, shape index: {}]   ;;  %s742_s8 = inlined_call_operand.hbm [shape: f32[2,32], index: 8, kind: output, shape index: {}]  }
   0x1   :  { %15 = vsyncpa [#allocation7], 0 }
   0x2   :  { %16 = vsyncpa [#allocation5], 0  ;;  %s581_s27 = smov [#allocation6]   ;;  %s582_s29 = smov [#allocation3]  }
   0x3   :  { %s36_s28 = sshll.u32 %s581_s27, 4  ;;  %s22_s30 = sshll.u32 %s582_s29, 4  ;;  %s37_s28 = int_to_ptr.vmem [resolvable:$true] %s36_s28  ;;  %s636_s30 = int_to_ptr.vmem [resolvable:$true] %s22_s30 }
   0x4   :  { %s487_s11 = scalar_lea.hbm %s736_s2, 512 }
   0x5   :  { %p488_p0 = scmp.ne.s32.totalorder %s736_s2, %s487_s11  ;;  %p491_p1 = scmp.lt.u32.totalorder %s487_s11, %s736_s2 }
   0x7   :  { %p493_p2 = pnand %p491_p1, %p488_p0 }
   0x9   :  { %496 = shalt.err (!%p493_p2)
}
   0xa   :  { %s497_s16 = scalar_lea.vmem %s37_s28, 512  ;;  %p502_p4 = scmp.lt.s32.totalorder %s37_s28, %s37_s28 }
   0xb   :  { %p498_p3 = scmp.ne.s32.totalorder %s37_s28, %s497_s16  ;;  %p503_p5 = scmp.lt.s32.totalorder %s497_s16, %s497_s16 }
   0xd   :  { %p504_p6 = por %p503_p5, %p502_p4 }
   0xf   :  { %p505_p7 = pnand %p504_p6, %p498_p3 }
  0x11   :  { %508 = shalt.err (!%p505_p7)
}
  0x12   :  { %s583_s17 = smov 128   ;;  %s584_s18 = smov 8  }
  0x13   :  { %42 = dma.hbm_to_vmem [thread:$0]  %s736_s2, 512, %s37_s28, [#allocation7], %s583_s17, %s583_s17, %s584_s18  }
  0x14   :  { %s509_s23 = scalar_lea.hbm %s734_s0, 256 }
  0x15   :  { %p510_p8 = scmp.ne.s32.totalorder %s734_s0, %s509_s23  ;;  %p513_p9 = scmp.lt.u32.totalorder %s509_s23, %s734_s0 }
  0x17   :  { %p515_p10 = pnand %p513_p9, %p510_p8 }
  0x19   :  { %518 = shalt.err (!%p515_p10)
}
  0x1a   :  { %s519_s29 = scalar_lea.vmem %s636_s30, 256  ;;  %p524_p12 = scmp.lt.s32.totalorder %s636_s30, %s636_s30 }
  0x1b   :  { %p520_p11 = scmp.ne.s32.totalorder %s636_s30, %s519_s29  ;;  %p525_p13 = scmp.lt.s32.totalorder %s519_s29, %s519_s29 }
  0x1d   :  { %p526_p0 = por %p525_p13, %p524_p12 }
  0x1f   :  { %p527_p1 = pnand %p526_p0, %p520_p11 }
  0x21   :  { %530 = shalt.err (!%p527_p1)
}
  0x22   :  { %28 = dma.hbm_to_vmem [thread:$0]  %s734_s0, 256, %s636_s30, [#allocation4], %s583_s17, %s583_s17, %s584_s18  }
  0x23   :  { %s585_s9 = smov [#allocation8]   ;;  %s531_s13 = scalar_lea.hbm %s738_s4, 512 }
  0x24   :  { %s50_s10 = sshll.u32 %s585_s9, 4  ;;  %p532_p2 = scmp.ne.s32.totalorder %s738_s4, %s531_s13  ;;  %s51_s10 = int_to_ptr.vmem [resolvable:$true] %s50_s10 }
  0x25   :  { %p535_p3 = scmp.lt.u32.totalorder %s531_s13, %s738_s4 }
  0x27   :  { %p537_p4 = pnand %p535_p3, %p532_p2 }
  0x29   :  { %540 = shalt.err (!%p537_p4)
}
  0x2a   :  { %s541_s20 = scalar_lea.vmem %s51_s10, 512  ;;  %p546_p6 = scmp.lt.s32.totalorder %s51_s10, %s51_s10 }
  0x2b   :  { %p542_p5 = scmp.ne.s32.totalorder %s51_s10, %s541_s20  ;;  %p547_p7 = scmp.lt.s32.totalorder %s541_s20, %s541_s20 }
  0x2d   :  { %p548_p8 = por %p547_p7, %p546_p6 }
  0x2f   :  { %p549_p9 = pnand %p548_p8, %p542_p5 }
  0x31   :  { %552 = shalt.err (!%p549_p9)
}
  0x32   :  { %56 = dma.hbm_to_vmem [thread:$0]  %s738_s4, 512, %s51_s10, [#allocation7], %s583_s17, %s583_s17, %s584_s18  }
  0x33   :  { %575 = dma.done.wait [#allocation4], 256  }
  0x34   :  { %576 = vsyncadd [#allocation4], 4294967040 }
  0x35   :  { %577 = dma.done.wait [#allocation7], 1024  }
  0x36   :  { %578 = vsyncadd [#allocation7], 4294966272  ;;  %v586_v0 = vmov 0.0|0.0   ;;  %vm587_vm0 = vmmov 0   ;;  %v588_v1 = vmov 0.0   ;;  %v170_v2 = vld [vmem:[#allocation6] sm:$0xff]  ;;  %v267_v26 = vlaneseq }
  0x37   :  { %453 = vmatprep.subr.bf16.mxu1 %v586_v0  ;;  %442 = vmatprep.mubr.msk.f32.mxu1 %vm587_vm0, %v588_v1  ;;  %v171_v3 = vld [vmem:[#allocation6 + $0x8] sm:$0xff]  ;;  %v172_v4 = vld [vmem:[#allocation6 + $0x10] sm:$0xff]  ;;  %v173_v6 = vld [vmem:[#allocation6 + $0x18] sm:$0xff]  ;;  %vm86_vm1 = vcmask 261120   ;;  %v589_v24 = vmov 1966171168   ;;  %v305_v48 = vstv %s741_s7 }
  0x38   :  { %v454_v5 = vpack.c.bf16 %v171_v3, %v170_v2  ;;  %v75_v7 = vld [vmem:[#allocation8] sm:$0xff]  ;;  %v76_v8 = vld [vmem:[#allocation8 + $0x8] sm:$0xff]  ;;  %v77_v10 = vld [vmem:[#allocation8 + $0x10] sm:$0xff]  ;;  %v457_v12 = vpack.c.bf16 %v173_v6, %v172_v4  ;;  %v265_v25 = vunpack.c.l.s4 %v589_v24  ;;  %v268_v29 = vshrl.u32 %v267_v26, 7  ;;  %s590_s7 = smov [#allocation9]  }
  0x39   :  { %v445_v9 = vpack.c.bf16 %v76_v8, %v75_v7  ;;  %v78_v11 = vld [vmem:[#allocation8 + $0x18] sm:$0xff]  ;;  %v688_v14 = vld [vmem:[#allocation3] sm:$0xff]  ;;  %vm362_vm2 = vcmask 1041409   ;;  %vm365_vm3 = vcmask 254976   ;;  %s396_s24 = sshll.u32 %s590_s7, 4  ;;  %s397_s24 = int_to_ptr.vmem [resolvable:$true] %s396_s24 }
  0x3a   :  { %455 = vmatpush3.bf16.msra.mxu1 %v454_v5  ;;  %v449_v13 = vpack.c.bf16 %v78_v11, %v77_v10  ;;  %431 = vmatprep.mubr.msk.f32.mxu0 %vm86_vm1, %v688_v14  ;;  %v74_v15 = vld [vmem:[%s735_s1] sm:$0x3]  ;;  %v695_v16 = vld [vmem:[#allocation3 + $0x8] sm:$0xff]  ;;  %v266_v28 = vunpack.c.0.s8 %v265_v25  ;;  %v288_v36 = vsub.s32 0, %v268_v29  ;;  %s553_s25 = scalar_lea.vmem %s397_s24, 32  ;;  %p558_p11 = scmp.lt.s32.totalorder %s397_s24, %s397_s24 }
  0x3b   :  { %456 = vmatprep.subr.bf16.mxu1 %v586_v0  ;;  %446 = vmatprep.subr.bf16.mxu0 %v445_v9  ;;  %v409_v17 = vld [vmem:[%s737_s3] ss:$0 sm:$0xff]  ;;  %p554_p10 = scmp.ne.s32.totalorder %s397_s24, %s553_s25  ;;  %p559_p12 = scmp.lt.s32.totalorder %s553_s25, %s553_s25 }
  0x3c   :  { %448 = vmatpush3.bf16.msra.mxu0 %v445_v9  ;;  %v406_v22 = vld [vmem:[%s739_s5] ss:$0 sm:$0xff]  ;;  %v269_v32 = vsub.s32 %v266_v28, %v268_v29 }
  0x3d   :  { %450 = vmatprep.subr.bf16.mxu0 %v449_v13  ;;  %v411_v31 = vld [vmem:[%s740_s6] ss:$0 sm:$0xff]  ;;  %p560_p13 = por %p559_p12, %p558_p11 }
  0x3e   :  { %458 = vmatpush3.bf16.msra.mxu1 %v457_v12 }
  0x3f   :  { %p561_p0 = pnand %p560_p13, %p554_p10 }
  0x40   :  { %452 = vmatpush3.bf16.msra.mxu0 %v449_v13 }
  0x41   :  { %443 = vmatmul.mubr.msk.f32.vlgmr.msra.gmra.mrb[0].mxu1 %vm86_vm1, %v74_v15 }
  0x43   :  { %432 = vmatmul.mubr.msk.f32.vlgmr.msra.gmra.mrb[0].mxu0 %vm86_vm1, %v695_v16 }
 0x114   :  { %v250_v18 = vpop.f32.mrb[0].mxu1 }
 0x115   :  { %v251_v19 = vadd.f32 %v409_v17, %v250_v18  ;;  %v444_v20 = vpop.f32.mrb[1].mxu1 }
 0x116   :  { %v433_v21 = vpop.f32.mrb[0].mxu0 }
 0x117   :  { %469 = vtanh.f32 %v251_v19  ;;  %v159_v23 = vpop.f32.mrb[1].mxu0  ;;  %v165_v30 = vadd.f32 %v433_v21, %v406_v22 }
 0x118   :  { %v160_v27 = vadd.f32 %v406_v22, %v159_v23 }
 0x11a   :  { %471 = vtanh.f32 %v160_v27 }
 0x11b   :  { %473 = vtanh.f32 %v165_v30 }
 0x121   :  { %v470_v33 = vpop.eup %469 }
 0x122   :  { %v262_v34 = vmul.f32 %v470_v33, %v411_v31 }
 0x124   :  { %v270_v35 = vrot.slane %v262_v34, %v269_v32  ;;  %v472_v39 = vpop.eup %471 }
 0x125   :  { %v474_v44 = vpop.eup %473 }
 0x126   :  { %v278_v37 = vrot.slane %v270_v35, %v269_v32  ;;  %v271_v38 = vcombine.high %v270_v35, %v270_v35 }
 0x128   :  { %v289_v40 = vrot.slane %v278_v37, %v288_v36  ;;  %v285_v41 = vrot.slane %v271_v38, %v269_v32 }
 0x12a   :  { %v296_v42 = vmul.f32 %v472_v39, %v289_v40  ;;  %v293_v43 = vrot.slane %v285_v41, %v288_v36 }
 0x12c   :  { %v298_v45 = vsel %vm86_vm1, %v296_v42, 0.0  ;;  %v297_v46 = vmul.f32 %v474_v44, %v293_v43 }
 0x12d   :  { %299 = vadd.xlane.f32.xlu0 %v298_v45 }
 0x12e   :  { %v301_v47 = vsel %vm86_vm1, %v297_v46, 0.0 }
 0x131   :  { %302 = vadd.xlane.f32.xlu0 %v301_v47 }
 0x1ba   :  { %v300_v49 = vpop.xlane.xlu0 %299 }
 0x1bb   :  { %v306_v50 = vadd.f32 %v305_v48, %v300_v49 }
 0x1bd   :  { %v308_v51 = vrot.slane %v306_v50, 4 }
 0x1be   :  { %v303_v52 = vpop.xlane.xlu0 %302 }
 0x1bf   :  { %v309_v53 = vmax.f32 %v306_v50, %v308_v51  ;;  %v307_v54 = vadd.f32 %v305_v48, %v303_v52 }
 0x1c1   :  { %v310_v55 = vrot.slane %v309_v53, 2  ;;  %v314_v56 = vrot.slane %v307_v54, 4 }
 0x1c3   :  { %v311_v57 = vmax.f32 %v309_v53, %v310_v55  ;;  %v315_v58 = vmax.f32 %v307_v54, %v314_v56 }
 0x1c5   :  { %v312_v59 = vrot.slane %v311_v57, 1  ;;  %v316_v60 = vrot.slane %v315_v58, 2 }
 0x1c7   :  { %v313_v61 = vmax.f32 %v311_v57, %v312_v59  ;;  %v317_v62 = vmax.f32 %v315_v58, %v316_v60 }
 0x1c9   :  { %v320_v63 = vsub.f32 %v306_v50, %v313_v61  ;;  %v318_v0 = vrot.slane %v317_v62, 1 }
 0x1cb   :  { %v322_v1 = vmul.f32 1.442695, %v320_v63  ;;  %v319_v2 = vmax.f32 %v317_v62, %v318_v0 }
 0x1cd   :  { %475 = vpow2.f32 %v322_v1  ;;  %v321_v3 = vsub.f32 %v307_v54, %v319_v2 }
 0x1cf   :  { %v324_v4 = vmul.f32 1.442695, %v321_v3 }
 0x1d1   :  { %477 = vpow2.f32 %v324_v4 }
 0x1d7   :  { %v476_v5 = vpop.eup %475 }
 0x1d8   :  { %v326_v6 = vrot.slane %v476_v5, 4 }
 0x1da   :  { %v327_v7 = vadd.f32 %v476_v5, %v326_v6 }
 0x1db   :  { %v478_v8 = vpop.eup %477 }
 0x1dc   :  { %v332_v9 = vrot.slane %v478_v8, 4  ;;  %v328_v10 = vrot.slane %v327_v7, 2 }
 0x1de   :  { %v333_v11 = vadd.f32 %v478_v8, %v332_v9  ;;  %v329_v12 = vadd.f32 %v328_v10, %v327_v7 }
 0x1e0   :  { %v330_v13 = vrot.slane %v329_v12, 1  ;;  %v334_v15 = vrot.slane %v333_v11, 2 }
 0x1e2   :  { %v331_v17 = vadd.f32 %v330_v13, %v329_v12  ;;  %v335_v18 = vadd.f32 %v334_v15, %v333_v11 }
 0x1e4   :  { %v336_v19 = vrot.slane %v335_v18, 1  ;;  %479 = vrcp.f32 %v331_v17 }
 0x1e6   :  { %v337_v20 = vadd.f32 %v336_v19, %v335_v18 }
 0x1e8   :  { %481 = vrcp.f32 %v337_v20 }
 0x1ee   :  { %v480_v21 = vpop.eup %479 }
 0x1ef   :  { %v340_v22 = vmul.f32 %v480_v21, %v476_v5 }
 0x1f1   :  { %v342_v23 = vmul.f32 %v340_v22, %v688_v14 }
 0x1f2   :  { %v482_v24 = vpop.eup %481 }
 0x1f3   :  { %v341_v25 = vmul.f32 %v482_v24, %v478_v8  ;;  %v344_v26 = vsel %vm86_vm1, %v342_v23, 0.0 }
 0x1f4   :  { %v345_v27 = vrot.slane %v344_v26, 4 }
 0x1f5   :  { %v343_v28 = vmul.f32 %v341_v25, %v695_v16 }
 0x1f6   :  { %v346_v29 = vadd.f32 %v345_v27, %v344_v26 }
 0x1f7   :  { %v351_v30 = vsel %vm86_vm1, %v343_v28, 0.0 }
 0x1f8   :  { %v347_v31 = vrot.slane %v346_v29, 2  ;;  %v352_v32 = vrot.slane %v351_v30, 4 }
 0x1fa   :  { %v348_v33 = vadd.f32 %v347_v31, %v346_v29  ;;  %v353_v34 = vadd.f32 %v352_v32, %v351_v30 }
 0x1fc   :  { %v349_v35 = vrot.slane %v348_v33, 1  ;;  %v354_v36 = vrot.slane %v353_v34, 2 }
 0x1fe   :  { %v355_v37 = vadd.f32 %v354_v36, %v353_v34  ;;  %v350_v38 = vadd.f32 %v349_v35, %v348_v33 }
 0x200   :  { %v356_v39 = vrot.slane %v355_v37, 1  ;;  %v358_v40 = vmul.f32 %v350_v38, %v350_v38 }
 0x202   :  { %v357_v14 = vadd.f32 %v356_v39, %v355_v37 }
 0x204   :  { %v359_v41 = vmul.f32 %v357_v14, %v357_v14 }
 0x206   :  { %v363_v42 = vsel %vm362_vm2, %v359_v41, %v358_v40 }
 0x207   :  { %v366_v16 = vsel %vm365_vm3, %v363_v42, 0.0 }
 0x208   :  { %367 = vadd.xlane.f32.xlu1 %v366_v16 }
 0x295   :  { %v368_v43 = vpop.xlane.xlu1 %367 }
 0x296   :  { %483 = vrsqrt.f32 %v368_v43  ;;  %vm371_vm4 = vcmp.eq.f32.partialorder %v368_v43, inf  ;;  %v374_v46 = vand.u32 2147483648, %v368_v43  ;;  %vm373_vm5 = vcmp.eq.f32.partialorder %v368_v43, 0.0 }
 0x2a0   :  { %v484_v44 = vpop.eup %483 }
 0x2a1   :  { %v370_v45 = vmul.f32 %v484_v44, %v368_v43 }
 0x2a3   :  { %v372_v47 = vsel %vm371_vm4, %v368_v43, %v370_v45 }
 0x2a4   :  { %v375_v48 = vsel %vm373_vm5, %v374_v46, %v372_v47 }
 0x2a5   :  { %v376_v49 = vadd.f32 1e-08, %v375_v48 }
 0x2a7   :  { %485 = vrcp.f32 %v376_v49 }
 0x2b1   :  { %v486_v50 = vpop.eup %485 }
 0x2b2   :  { %v379_v51 = vrot.slane %v486_v50, 1  ;;  %v382_v53 = vmul.f32 %v486_v50, %v350_v38 }
 0x2b4   :  { %v383_v52 = vmul.f32 %v379_v51, %v357_v14 }
 0x2b6   :  { %v386_v54 = vrot.slane %v383_v52, 7 }
 0x2b8   :  { %v387_v55 = vsel %vm362_vm2, %v386_v54, %v382_v53 }
 0x2b9   :  { %389 = vst.msk [vmem:[#allocation9] sm:$0x3] %vm365_vm3, %v387_v55 }
 0x2ba   :  { %564 = shalt.err (!%p561_p0)
}
 0x2bb   :  { %s565_s29 = scalar_lea.hbm %s742_s8, 32 }
 0x2bc   :  { %p566_p1 = scmp.ne.s32.totalorder %s742_s8, %s565_s29  ;;  %p569_p2 = scmp.lt.u32.totalorder %s565_s29, %s742_s8 }
 0x2be   :  { %p571_p3 = pnand %p569_p2, %p566_p1 }
 0x2c0   :  { %574 = shalt.err (!%p571_p3)
}
 0x2c1   :  { %399 = dma.vmem_to_hbm [thread:$0]  %s397_s24, 32, %s742_s8, [#allocation5]  }
 0x2c2   :  { %579 = dma.done.wait [#allocation5], 32  }
 0x2c3   :  { %580 = vsyncadd [#allocation5], 4294967264 }
 0x2c4   :  { %403 = vsyncpa [#allocation4], 1 }
 0x2c5   :  { %404 = vsyncpa [#allocation7], 1 }
 0x2c6   :  { %405 = vsyncpa [#allocation5], 1 }

</bundles_post_ra>
